<compile_context>
chip_gen: v7x
topology: tpu7x:2x2x1
jax: 0.10.0
libtpu: 0.0.40
codegen_flags: <defaults>
</compile_context>

<pallas_src>
import math
from functools import partial

import jax
import jax.numpy as jnp
from jax.experimental import pallas as pl
from jax.experimental.pallas import tpu as pltpu


def _round_up(v, m):
    return ((v + m - 1) // m) * m


def _causal_conv1d_kernel(x_ref, w_ref, b_ref, o_ref, carry_ref):
    """One (batch row, time tile) block of the dilated causal conv (kernel_size=2)."""
    t_i = pl.program_id(1)

    f_out = o_ref.shape[1]          # output channels
    tt = o_ref.shape[2]             # time-tile width (lane dim)
    hc = carry_ref.shape[1]         # = min(dilation, tt): leading columns needing history

    cur = x_ref[0]                  # (C, TT): channels on sublanes, time on lanes

    # Both conv taps in ONE MXU matmul (f32 accumulation):
    #   rows [0, F)  of w_packed are tap-0 (act on x[t - dilation])
    #   rows [F, 2F) of w_packed are tap-1 (act on x[t])
    acc = jnp.dot(w_ref[...], cur, preferred_element_type=jnp.float32)   # (2F, TT)
    z0 = acc[:f_out, :]             # tap-0 products at the *unshifted* time index
    z1 = acc[f_out:, :]             # tap-1 products

    @pl.when(t_i == 0)
    def _():                        # first tile of a batch row: no history
        carry_ref[...] = jnp.zeros_like(carry_ref)

    prev_tail = carry_ref[...]                  # previous tile's z0[:, tt-hc:] (f32)
    carry_ref[...] = z0[:, tt - hc:]            # hand this tile's tail to the next tile

    b = b_ref[...]                              # (F, 1), broadcasts along time lanes

    # Columns [hc, TT): history lives inside this tile -> add tap-0 shifted right
    # by `dilation` (== hc on this path) via static lane slices.
    if hc < tt:
        o_ref[0, :, hc:] = (z1[:, hc:] + z0[:, :tt - hc] + b).astype(o_ref.dtype)
    # Columns [0, hc): history comes from the previous time tile (zeros at t_i == 0).
    o_ref[0, :, :hc] = (z1[:, :hc] + prev_tail + b).astype(o_ref.dtype)


def _pick_time_tile(T, C, F_out, dilation, itemsize, time_tile=None):
    """Pick a lane-dense time tile: as large as possible while staying well inside
    the scoped VMEM budget (v7x: 64 MiB physical / 32 MiB scoped default)."""
    if time_tile is not None and time_tile >= T:
        return T
    if time_tile is None:
        c_pad = _round_up(C, 8)
        f_pad = _round_up(F_out, 8)
        per_col = 2 * itemsize * (c_pad + f_pad)        # double-buffered x + out blocks
        budget = 16 * 1024 * 1024                       # conservative per-kernel budget
        tt = min(8192, max(128, budget // max(per_col, 1)))
    else:
        tt = int(time_tile)
    # History may only span the immediately previous tile, and sub-T tiles must be
    # lane-dense (multiples of 128).
    tt = _round_up(max(tt, dilation), 128)
    return T if tt >= T else tt


def causal_conv1d(x, weight, bias, dilation=2, time_tile=None):
    """Pallas TPU forward of CausalConv1d.

    x:      (N, C, T)  input, PyTorch NCT layout (kept native — no transposes)
    weight: (F, C, 2)  nn.Conv1d weight (kernel_size=2)
    bias:   (F,)
    returns (N, F, T)
    """
    assert dilation >= 1
    N, C, T = x.shape
    F_out = weight.shape[0]
    assert weight.shape == (F_out, C, 2)

    # Pack both taps into a single (2F, C) operand -> one MXU dot per step.
    w_packed = jnp.concatenate([weight[:, :, 0], weight[:, :, 1]], axis=0)
    b2 = bias.astype(jnp.float32).reshape(F_out, 1)

    tt = _pick_time_tile(T, C, F_out, dilation, jnp.dtype(x.dtype).itemsize, time_tile)
    n_t = pl.cdiv(T, tt)            # ragged final tile: OOB columns masked on writeback
    hc = min(dilation, tt)

    grid_spec = pltpu.PrefetchScalarGridSpec(
        num_scalar_prefetch=0,
        grid=(N, n_t),
        in_specs=[
            pl.BlockSpec((1, C, tt), lambda n, t: (n, 0, t)),       # x tile, NCT native
            pl.BlockSpec((2 * F_out, C), lambda n, t: (0, 0)),      # packed conv taps
            pl.BlockSpec((F_out, 1), lambda n, t: (0, 0)),          # bias column
        ],
        out_specs=pl.BlockSpec((1, F_out, tt), lambda n, t: (n, 0, t)),
        scratch_shapes=[pltpu.VMEM((F_out, hc), jnp.float32)],      # tiny causal carry
    )

    return pl.pallas_call(
        _causal_conv1d_kernel,
        out_shape=jax.ShapeDtypeStruct((N, F_out, T), x.dtype),
        grid_spec=grid_spec,
        compiler_params=pltpu.CompilerParams(
            # batch rows are independent (megacore); time tiles carry causal state.
            dimension_semantics=("parallel", "arbitrary"),
            # Raise v5e's 16 MiB scoped default; actual use stays far below v7x's 64 MiB.
            vmem_limit_bytes=64 * 1024 * 1024,
        ),
    )(x, w_packed, b2)


def causal_conv1d_reference(x, weight, bias, dilation):
    """Pure-JAX reference matching the PyTorch module."""
    N, C, T = x.shape
    x_prev = jnp.pad(x, ((0, 0), (0, 0), (dilation, 0)))[:, :, :T]
    return (jnp.einsum('nct,fc->nft', x_prev, weight[:, :, 0])
            + jnp.einsum('nct,fc->nft', x, weight[:, :, 1])
            + bias[None, :, None])


if __name__ == "__main__":
    # Small shapes consistent with the module defaults:
    # batch=2, in_channels=4, out_channels=8, seq_len=16, kernel_size=2, dilation=2.
    N, C_IN, F_OUT, T, DILATION = 2, 4, 8, 16, 2

    key = jax.random.PRNGKey(0)
    kx, kw, kb = jax.random.split(key, 3)
    x = jax.random.normal(kx, (N, C_IN, T), jnp.float32)
    bound = 1.0 / math.sqrt(C_IN * 2)                    # Conv1d default: fan_in = C * k
    weight = jax.random.uniform(kw, (F_OUT, C_IN, 2), jnp.float32, -bound, bound)
    bias = jax.random.uniform(kb, (F_OUT,), jnp.float32, -bound, bound)

    # Primary case: single time tile (tt == T).
    y_ref = causal_conv1d_reference(x, weight, bias, DILATION)
    y = jax.block_until_ready(
        jax.jit(partial(causal_conv1d, dilation=DILATION))(x, weight, bias))
    assert y.shape == (N, F_OUT, T), y.shape
    assert bool(jnp.all(jnp.isfinite(y)))
    err = float(jnp.max(jnp.abs(y - y_ref)))
    assert err < 2e-2, f"max abs error {err}"

    # Exercise the multi-tile causal carry and a ragged (non-divisible) final tile.
    for (T2, tile, dil) in ((384, 128, 4), (200, 128, 2)):
        x2 = jax.random.normal(kx, (N, C_IN, T2), jnp.float32)
        y2_ref = causal_conv1d_reference(x2, weight, bias, dil)
        y2 = jax.block_until_ready(
            jax.jit(partial(causal_conv1d, dilation=dil, time_tile=tile))(x2, weight, bias))
        assert y2.shape == (N, F_OUT, T2), y2.shape
        assert bool(jnp.all(jnp.isfinite(y2)))
        err2 = float(jnp.max(jnp.abs(y2 - y2_ref)))
        assert err2 < 2e-2, f"max abs error {err2} (T={T2}, tile={tile}, d={dil})"

    print("KERNEL_OK")
</pallas_src>

<mosaic_0001>
module attributes {stable_mosaic.version = 11 : i64} {
  func.func @_causal_conv1d_kernel(%arg0: i32, %arg1: i32, %arg2: memref<1x4x16xf32, #tpu.memory_space<vmem>>, %arg3: memref<16x4xf32, #tpu.memory_space<vmem>>, %arg4: memref<8x1xf32, #tpu.memory_space<vmem>>, %arg5: memref<1x8x16xf32, #tpu.memory_space<vmem>>, %arg6: memref<8x2xf32, #tpu.memory_space<vmem>>) attributes {dimension_semantics = [#tpu.dimension_semantics<parallel>, #tpu.dimension_semantics<arbitrary>], iteration_bounds = array<i64: 2, 1>, scalar_prefetch = 0 : i64, scratch_operands = 1 : i64, tpu.core_type = #tpu.core_type<tc>, window_params = [{transform_indices = @transform_0, window_bounds = array<i64: 1, 4, 16>}, {pipeline_mode = #tpu.pipeline_mode<synchronous>, transform_indices = @transform_1, window_bounds = array<i64: 16, 4>}, {pipeline_mode = #tpu.pipeline_mode<synchronous>, transform_indices = @transform_2, window_bounds = array<i64: 8, 1>}, {transform_indices = @transform_3, window_bounds = array<i64: 1, 8, 16>}]} {
    %c0 = arith.constant 0 : index
    %c0_0 = arith.constant 0 : index
    %c0_1 = arith.constant 0 : index
    %0 = vector.load %arg2[%c0, %c0_0, %c0_1] : memref<1x4x16xf32, #tpu.memory_space<vmem>>, vector<1x4x16xf32>
    %1 = vector.shape_cast %0 : vector<1x4x16xf32> to vector<4x16xf32>
    %c0_2 = arith.constant 0 : index
    %c0_3 = arith.constant 0 : index
    %2 = vector.load %arg3[%c0_2, %c0_3] : memref<16x4xf32, #tpu.memory_space<vmem>>, vector<16x4xf32>
    %cst = arith.constant dense<0.000000e+00> : vector<16x16xf32>
    %3 = tpu.matmul %2, %1, %cst {dimension_numbers = #tpu.dot_dimension_numbers<[1], [0], [0], [1], [0, 0, 1, 1], [], []>} : vector<16x4xf32>, vector<4x16xf32>, vector<16x16xf32> -> vector<16x16xf32>
    %4 = vector.extract_strided_slice %3 {offsets = [0, 0], sizes = [8, 16], strides = [1, 1]} : vector<16x16xf32> to vector<8x16xf32>
    %5 = vector.extract_strided_slice %3 {offsets = [8, 0], sizes = [8, 16], strides = [1, 1]} : vector<16x16xf32> to vector<8x16xf32>
    %c0_i32 = arith.constant 0 : i32
    %6 = arith.cmpi eq, %arg1, %c0_i32 : i32
    %7 = arith.extui %6 : i1 to i32
    %c0_i32_4 = arith.constant 0 : i32
    %8 = arith.cmpi ne, %7, %c0_i32_4 : i32
    scf.if %8 {
      %cst_16 = arith.constant 0.000000e+00 : f32
      %28 = vector.broadcast %cst_16 : f32 to vector<8x2xf32>
      %c0_17 = arith.constant 0 : index
      %c0_18 = arith.constant 0 : index
      %29 = vector.load %arg6[%c0_17, %c0_18] : memref<8x2xf32, #tpu.memory_space<vmem>>, vector<8x2xf32>
      tpu.vector_store %arg6[%c0_17, %c0_18], %28 {strides = array<i32>} : memref<8x2xf32, #tpu.memory_space<vmem>>, vector<8x2xf32>,
    } else {
    }
    %c0_5 = arith.constant 0 : index
    %c0_6 = arith.constant 0 : index
    %9 = vector.load %arg6[%c0_5, %c0_6] : memref<8x2xf32, #tpu.memory_space<vmem>>, vector<8x2xf32>
    %10 = vector.extract_strided_slice %4 {offsets = [0, 14], sizes = [8, 2], strides = [1, 1]} : vector<8x16xf32> to vector<8x2xf32>
    %c0_7 = arith.constant 0 : index
    %c0_8 = arith.constant 0 : index
    %11 = vector.load %arg6[%c0_7, %c0_8] : memref<8x2xf32, #tpu.memory_space<vmem>>, vector<8x2xf32>
    tpu.vector_store %arg6[%c0_7, %c0_8], %10 {strides = array<i32>} : memref<8x2xf32, #tpu.memory_space<vmem>>, vector<8x2xf32>,
    %c0_9 = arith.constant 0 : index
    %c0_10 = arith.constant 0 : index
    %12 = vector.load %arg4[%c0_9, %c0_10] : memref<8x1xf32, #tpu.memory_space<vmem>>, vector<8x1xf32>
    %13 = vector.extract_strided_slice %5 {offsets = [0, 2], sizes = [8, 14], strides = [1, 1]} : vector<8x16xf32> to vector<8x14xf32>
    %14 = vector.extract_strided_slice %4 {offsets = [0, 0], sizes = [8, 14], strides = [1, 1]} : vector<8x16xf32> to vector<8x14xf32>
    %15 = arith.addf %13, %14 : vector<8x14xf32>
    %16 = vector.broadcast %12 : vector<8x1xf32> to vector<8x14xf32>
    %17 = arith.addf %15, %16 : vector<8x14xf32>
    %c0_11 = arith.constant 0 : index
    %c0_12 = arith.constant 0 : index
    %c2 = arith.constant 2 : index
    %18 = vector.load %arg5[%c0_11, %c0_12, %c2] : memref<1x8x16xf32, #tpu.memory_space<vmem>>, vector<1x8x14xf32>
    %19 = vector.shape_cast %18 : vector<1x8x14xf32> to vector<8x14xf32>
    %20 = vector.shape_cast %17 : vector<8x14xf32> to vector<1x8x14xf32>
    tpu.vector_store %arg5[%c0_11, %c0_12, %c2], %20 {strides = array<i32>} : memref<1x8x16xf32, #tpu.memory_space<vmem>>, vector<1x8x14xf32>,
    %21 = vector.extract_strided_slice %5 {offsets = [0, 0], sizes = [8, 2], strides = [1, 1]} : vector<8x16xf32> to vector<8x2xf32>
    %22 = arith.addf %21, %9 : vector<8x2xf32>
    %23 = vector.broadcast %12 : vector<8x1xf32> to vector<8x2xf32>
    %24 = arith.addf %22, %23 : vector<8x2xf32>
    %c0_13 = arith.constant 0 : index
    %c0_14 = arith.constant 0 : index
    %c0_15 = arith.constant 0 : index
    %25 = vector.load %arg5[%c0_13, %c0_14, %c0_15] : memref<1x8x16xf32, #tpu.memory_space<vmem>>, vector<1x8x2xf32>
    %26 = vector.shape_cast %25 : vector<1x8x2xf32> to vector<8x2xf32>
    %27 = vector.shape_cast %24 : vector<8x2xf32> to vector<1x8x2xf32>
    tpu.vector_store %arg5[%c0_13, %c0_14, %c0_15], %27 {strides = array<i32>} : memref<1x8x16xf32, #tpu.memory_space<vmem>>, vector<1x8x2xf32>,
    return
  }
  func.func @transform_0(%arg0: i32, %arg1: i32) -> (i32, i32, i32) {
    %c0_i32 = arith.constant 0 : i32
    %c0_i32_0 = arith.constant 0 : i32
    return %arg0, %c0_i32, %arg1 : i32, i32, i32
  }
  func.func @transform_1(%arg0: i32, %arg1: i32) -> (i32, i32) {
    %c0_i32 = arith.constant 0 : i32
    %c0_i32_0 = arith.constant 0 : i32
    %c0_i32_1 = arith.constant 0 : i32
    return %c0_i32, %c0_i32_0 : i32, i32
  }
  func.func @transform_2(%arg0: i32, %arg1: i32) -> (i32, i32) {
    %c0_i32 = arith.constant 0 : i32
    %c0_i32_0 = arith.constant 0 : i32
    %c0_i32_1 = arith.constant 0 : i32
    return %c0_i32, %c0_i32_0 : i32, i32
  }
  func.func @transform_3(%arg0: i32, %arg1: i32) -> (i32, i32, i32) {
    %c0_i32 = arith.constant 0 : i32
    %c0_i32_0 = arith.constant 0 : i32
    return %arg0, %c0_i32, %arg1 : i32, i32, i32
  }
}

</mosaic_0001>

<bundles_post_ra>
// kernel: causal_conv1d.1
= control target key start
LH: loop header
LB: loop body
LE: loop exit
PB: predicated region body
PF: predicated region fallthrough
CT: control target
= control target key end

     0   :  { %8 = vsyncpa [#allocation4], 0  ;;  %s1038_s0 = inlined_call_operand.hbm [shape: f32[2,4,16], index: 0, kind: input, shape index: {}]   ;;  %s1039_s1 = inlined_call_operand.hbm [shape: f32[16,4], index: 1, kind: input, shape index: {}]   ;;  %s1040_s2 = inlined_call_operand.hbm [shape: f32[8,1], index: 2, kind: input, shape index: {}]   ;;  %s1041_s3 = inlined_call_operand.hbm [shape: f32[2,8,16], index: 3, kind: output, shape index: {}]  }
   0x1   :  { %10 = vsyncpa [#allocation4 + $0x1], 0 }
   0x2   :  { %11 = vsyncpa [#allocation7], 0 }
   0x3   :  { %12 = vsyncpa [#allocation5], 0 }
   0x4   :  { %14 = vsyncpa [#allocation5 + $0x1], 0  ;;  %s784_s12 = smov 0   ;;  %s786_s13 = smov 0  }
   0x5   :  { %s788_s14 = smov 0   ;;  %s790_s15 = smov 0  }
   0x6   :  { %s792_s16 = smov 0   ;;  %s794_s17 = smov 0  }
   0x7 LB: > { %s462_s18 = sadd.s32 4294967295, %s752_s17   ;;  %s463_s19 = sadd.s32 4294967294, %s752_s17   ;;  %s752_s17 = sphi %s794_s17, %s20_s17   ;;  %s748_s16 = sphi %s792_s16, %s1063_s16   ;;  %s744_s15 = sphi %s790_s15, %s1062_s15   ;;  %s740_s14 = sphi %s788_s14, %s1061_s14   ;;  %s736_s13 = sphi %s786_s13, %s1060_s13   ;;  %s732_s12 = sphi %s784_s12, %s1059_s12  }
   0x8   : > { %p54_p0 = scmp.ne.s32.totalorder %s736_s13, %s732_s12  ;;  %p818_p1 = scmp.eq.s32.totalorder %s462_s18, 0 }
   0x9   : > { %p822_p2 = scmp.eq.s32.totalorder %s462_s18, 1  ;;  %p128_p3 = scmp.eq.s32.totalorder %s463_s19, 1 }
   0xa   : > { %s1046_s20 = scalar_select %p818_p1, 1, 0 }
   0xb   : > { %p828_p4 = por %p818_p1, %p54_p0  ;;  %p464_p5 = scmp.ge.s32.totalorder %s752_s17, 1 }
   0xc   : > { %p833_p6 = por %p128_p3, %p54_p0  ;;  %p135_p7 = scmp.lt.s32.totalorder %s752_s17, 3 }
   0xd   : > { %s1048_s22 = scalar_select %p828_p4, 1, 0 }
   0xe   : > { %s1049_s23 = scalar_select %p833_p6, 1, 0 }
   0xf   : > { %p838_p8 = pnand %p464_p5, %p135_p7  ;;  %s754_s25 = smov [#allocation6]  }
  0x10   : > { %s147_s26 = sshll.u32 %s754_s25, 4  ;;  %s755_s28 = smov [#allocation8]   ;;  %s842_s26 = int_to_ptr.vmem [resolvable:$true] %s147_s26 }
  0x11   : > { %p502_p9 = pneg %p838_p8  ;;  %s161_s29 = sshll.u32 %s755_s28, 4  ;;  %s853_s29 = int_to_ptr.vmem [resolvable:$true] %s161_s29 }
  0x12   : > { %s580_s5 = scalar_lea.hbm %s1039_s1, 256 }
  0x13   : > { %p849_p11 = pnand %p502_p9, %p818_p1  ;;  %p581_p12 = scmp.ne.s32.totalorder %s1039_s1, %s580_s5 }
  0x14   : > { %p587_p5 = scmp.lt.u32.totalorder %s580_s5, %s1039_s1 }
  0x15   : > { %p582_p13 = pneg %p849_p11 }
  0x17   : > { %p583_p0 = pnand %p582_p13, %p581_p12 }
  0x19   : > { %p584_p3 = pneg %p583_p0 }
  0x1b   : > { %p589_p7 = pnand %p587_p5, %p584_p3 }
  0x1d   : > { %592 = shalt.err (!%p589_p7)
}
  0x1e   : > { %s593_s10 = scalar_lea.vmem %s842_s26, 256  ;;  %p601_p1 = scmp.lt.s32.totalorder %s842_s26, %s842_s26 }
  0x1f   : > { %p594_p9 = scmp.ne.s32.totalorder %s842_s26, %s593_s10  ;;  %p602_p12 = scmp.lt.s32.totalorder %s593_s10, %s593_s10 }
  0x21   : > { %p596_p10 = pnand %p594_p9, %p582_p13  ;;  %p603_p0 = por %p602_p12, %p601_p1 }
  0x23   : > { %p597_p6 = pneg %p596_p10 }
  0x25   : > { %p604_p4 = pnand %p603_p0, %p597_p6 }
  0x27   : > { %607 = shalt.err (!%p604_p4)
}
  0x28   : > { %s756_s11 = smov 128   ;;  %s757_s18 = smov 8  }
  0x29   : > { %505 = dma.hbm_to_vmem [thread:$0]  (!%p849_p11), %s1039_s1, 256, %s842_s26, [#allocation7], %s756_s11, %s756_s11, %s757_s18  }
  0x2a   : > { %s608_s4 = scalar_lea.hbm %s1040_s2, 128 }
  0x2b   : > { %p609_p1 = scmp.ne.s32.totalorder %s1040_s2, %s608_s4  ;;  %p615_p10 = scmp.lt.u32.totalorder %s608_s4, %s1040_s2 }
  0x2d   : > { %p611_p4 = pnand %p609_p1, %p582_p13 }
  0x2f   : > { %p612_p6 = pneg %p611_p4 }
  0x31   : > { %p617_p3 = pnand %p615_p10, %p612_p6 }
  0x33   : > { %620 = shalt.err (!%p617_p3)
}
  0x34   : > { %s621_s26 = scalar_lea.vmem %s853_s29, 128  ;;  %p629_p12 = scmp.lt.s32.totalorder %s853_s29, %s853_s29 }
  0x35   : > { %p622_p5 = scmp.ne.s32.totalorder %s853_s29, %s621_s26  ;;  %p630_p0 = scmp.lt.s32.totalorder %s621_s26, %s621_s26 }
  0x37   : > { %p624_p7 = pnand %p622_p5, %p582_p13  ;;  %p631_p1 = por %p630_p0, %p629_p12 }
  0x39   : > { %p625_p9 = pneg %p624_p7 }
  0x3b   : > { %p632_p4 = pnand %p631_p1, %p625_p9 }
  0x3d   : > { %635 = shalt.err (!%p632_p4)
}
  0x3e   : > { %508 = dma.hbm_to_vmem [thread:$0]  (!%p849_p11), %s1040_s2, 128, %s853_s29, [#allocation7]  }
  0x3f   : > { %s32_s11 = sadd.s32 1, %s748_s16  ;;  %s41_s18 = sadd.s32 1, %s740_s14 }
  0x40   : > { %p34_p13 = scmp.ge.s32.totalorder %s32_s11, 2  ;;  %p48_p6 = scmp.ne.s32.totalorder %s740_s14, %s736_s13 }
  0x41   : > { %p49_p10 = scmp.eq.s32.totalorder %s752_s17, 0  ;;  %p519_p3 = scmp.lt.s32.totalorder %s752_s17, 2 }
  0x42   : > { %s1065_s11 = smov (%p34_p13, %s32_s11), 0  ;;  %p917_p7 = por %p822_p2, %p48_p6 }
  0x43   : > { %p50_p5 = por %p49_p10, %p48_p6  ;;  %s36_s19 = ssub.s32 %s748_s16, %s1065_s11 }
  0x44   : > { %s1052_s27 = scalar_select %p917_p7, 1, 0 }
  0x45   : > { %s172_s25 = sand.u32 1, %s740_s14   ;;  %p39_p9 = scmp.eq.s32.totalorder %s36_s19, 0 }
  0x46   : > { %s468_s29 = sshll.u32 %s172_s25, 2  ;;  %s469_s28 = sshll.u32 %s748_s16, 6 }
  0x47   : > { %s926_s30 = scalar_select %p39_p9, %s740_s14, %s41_s18  }
  0x48   : > { %s931_s6 = scalar_lea.hbm %s1038_s0, %s469_s28  ;;  %s176_s21 = scalar_lea.vmem [#allocation3], %s468_s29 }
  0x49   : > { %s184_s7 = sshll.u32 %s176_s21, 4  ;;  %p935_p2 = pnand %p519_p3, %p50_p5  ;;  %s939_s7 = int_to_ptr.vmem [resolvable:$true] %s184_s7 }
  0x4a   : > { %s173_s26 = scalar_lea.sflag [#allocation4], %s172_s25  ;;  %s636_s9 = scalar_lea.hbm %s931_s6, 64 }
  0x4b   : > { %p637_p11 = scmp.ne.s32.totalorder %s931_s6, %s636_s9  ;;  %p638_p12 = pneg %p935_p2 }
  0x4c   : > { %s641_s19 = scalar_lea.hbm %s1038_s0, 128  ;;  %p642_p4 = scmp.lt.u32.totalorder %s931_s6, %s1038_s0 }
  0x4d   : > { %p639_p0 = pnand %p638_p12, %p637_p11  ;;  %p643_p13 = scmp.lt.u32.totalorder %s641_s19, %s636_s9 }
  0x4e   : > { %p645_p10 = scmp.lt.u32.totalorder %s636_s9, %s931_s6 }
  0x4f   : > { %p640_p1 = pneg %p639_p0  ;;  %p644_p6 = por %p643_p13, %p642_p4 }
  0x51   : > { %p646_p3 = por %p645_p10, %p644_p6 }
  0x53   : > { %p647_p5 = pnand %p646_p3, %p640_p1 }
  0x55   : > { %650 = shalt.err (!%p647_p5)
}
  0x56   : > { %s651_s25 = scalar_lea.vmem %s939_s7, 64  ;;  %s758_s4 = smov [#allocation3]  }
  0x57   : > { %p652_p9 = scmp.ne.s32.totalorder %s939_s7, %s651_s25  ;;  %s656_s5 = sshll.u32 %s758_s4, 4  ;;  %s657_s5 = int_to_ptr.vmem [resolvable:$false] %s656_s5 }
  0x58   : > { %s658_s21 = scalar_lea.vmem %s657_s5, 128  ;;  %p659_p7 = scmp.lt.s32.totalorder %s939_s7, %s657_s5 }
  0x59   : > { %p654_p11 = pnand %p652_p9, %p638_p12  ;;  %p660_p4 = scmp.lt.s32.totalorder %s658_s21, %s651_s25 }
  0x5b   : > { %p655_p0 = pneg %p654_p11  ;;  %p661_p13 = por %p660_p4, %p659_p7 }
  0x5d   : > { %p662_p6 = pnand %p661_p13, %p655_p0 }
  0x5f   : > { %665 = shalt.err (!%p662_p6)
}
  0x60   : > { %512 = dma.hbm_to_vmem [thread:$0]  (!%p935_p2), %s931_s6, 64, %s939_s7, %s173_s26  }
  0x61   : > { %193 = sbr.rel (%p838_p8) target bundleno = 459 (0x1cb), region = 32  ;;  %s969_s9 = sand.u32 (!%p838_p8), 1, %s736_s13  }
  0x62   : > { %s471_s10 = sshll.u32 (!%p838_p8), %s969_s9, 2  ;;  %s196_s18 = scalar_lea.sflag (!%p838_p8), [#allocation4], %s969_s9 }
  0x63   : > { %s199_s19 = scalar_lea.vmem (!%p838_p8), [#allocation3], %s471_s10  ;;  %p1054_p7 = scmp.ne.s32.totalorder (!%p838_p8), %s1048_s22, 0 }
  0x68   : > { %719 = dma.done.wait (%p1054_p7), %s196_s18, 64  }
  0x69   : > { %721 = vsyncadd (%p1054_p7), %s196_s18, 4294967232  ;;  %p1055_p12 = scmp.ne.s32.totalorder %s1046_s20, 0 }
  0x6b   : > { %723 = dma.done.wait (%p1055_p12), [#allocation7], 384  }
  0x6c   : > { %725 = vsyncadd (%p1055_p12), [#allocation7], 4294966912  ;;  %v759_v0 = vmov 0   ;;  %vm240_vm0 = vcmask 1043456   ;;  %vm233_vm1 = vcmask 31744   ;;  %v231_v2 = vld [vmem:[#allocation6] sm:$0xff] }
  0x6d   : > { %579 = vset.pattern.permute.xlu0 %v759_v0  ;;  %v230_v1 = vld [vmem:[%s199_s19] sm:$0xf]  ;;  %v232_v3 = vld [vmem:[#allocation6 + $0x8] sm:$0xff]  ;;  %487 = vmatprep.mubr.msk.f32.mxu0 %vm233_vm1, %v231_v2  ;;  %v332_v4 = vld [vmem:[#allocation8] sm:$0xff]  ;;  %vm323_vm2 = vcmask 15360   ;;  %v760_v5 = vmov 0.0  }
  0x6e   : > { %485 = vmatprep.subr.msk.mxu0 %vm240_vm0, %v230_v1  ;;  %339 = vperm.xlu0 %579, %v332_v4   ;;  %324 = vst.msk [vmem:[#allocation2] sm:$0xff] %vm323_vm2, %v760_v5  ;;  %s761_s20 = smov 114   ;;  %s762_s22 = smov 2   ;;  %vm343_vm3 = vcmask 130064  }
  0x6f   : > { %486 = vmatpush3.msk.msra.mxu0 %vm240_vm0, %v230_v1  ;;  %s474_s24 = sshll.u32 %s969_s9, 3  ;;  %s479_s6 = sshll.u32 %s744_s15, 7 }
  0x70   : > { %488 = vmatmul.mubr.msk.f32.vlgmr.msra.gmra.mrb[0].mxu0 %vm233_vm1, %v232_v3  ;;  %s229_s7 = scalar_lea.vmem [#allocation9], %s474_s24  ;;  %s988_s28 = scalar_lea.hbm %s1041_s3, %s479_s6 }
  0x71   : > { %s363_s8 = sshll.u32 %s229_s7, 4  ;;  %s349_s25 = scalar_lea.sflag [#allocation5], %s969_s9  ;;  %s990_s8 = int_to_ptr.vmem [resolvable:$true] %s363_s8 }
  0x72   : > { %s666_s15 = scalar_lea.vmem %s990_s8, 128  ;;  %p1056_p2 = scmp.ne.s32.totalorder %s1052_s27, 0 }
  0x73   : > { %p667_p8 = scmp.ne.s32.totalorder %s990_s8, %s666_s15  ;;  %s763_s4 = smov [#allocation9]  }
  0x74   : > { %s670_s5 = sshll.u32 %s763_s4, 4  ;;  %s671_s5 = int_to_ptr.vmem [resolvable:$false] %s670_s5 }
  0x75   : > { %v325_v9 = vld [vmem:[#allocation2] sm:$0xff]  ;;  %p668_p1 = pnand %p667_p8, %p1056_p2  ;;  %s672_s21 = scalar_lea.vmem %s671_s5, 256 }
  0x76   : > { %p673_p3 = scmp.lt.s32.totalorder %s990_s8, %s671_s5  ;;  %p674_p5 = scmp.lt.s32.totalorder %s672_s21, %s666_s15 }
  0x77   : > { %p669_p10 = pneg %p668_p1 }
  0x78   : > { %p675_p9 = por %p674_p5, %p673_p3 }
  0x7a   : > { %p676_p11 = pnand %p675_p9, %p669_p10 }
  0xed   : > { %v340_v8 = vpop.permute.xlu0 %339 }
 0x143   : > { %v489_v6 = vpop.f32.mrb[0].mxu0 }
 0x144   : > { %v310_v7 = vpop.f32.mrb[1].mxu0  ;;  %v345_v10 = vadd.f32 %v489_v6, %v325_v9 }
 0x145   : > { %327 = vrot.lane.b32.xlu1 %v310_v7, %s761_s20  ;;  %333 = vrot.lane.b32.xlu0 %v310_v7, %s762_s22 }
 0x146   : > { %v346_v15 = vadd.f32 %v345_v10, %v340_v8 }
 0x1b7   : > { %v328_v11 = vpop.permute.xlu1 %327  ;;  %v334_v12 = vpop.permute.xlu0 %333 }
 0x1b8   : > { %331 = vst.msk [vmem:[#allocation2] sm:$0xff] %vm323_vm2, %v328_v11  ;;  %v336_v13 = vadd.f32 %v489_v6, %v334_v12 }
 0x1ba   : > { %v342_v14 = vadd.f32 %v340_v8, %v336_v13 }
 0x1bc   : > { %344 = vst.msk [vmem:[%s229_s7] sm:$0xff] %vm343_vm3, %v342_v14 }
 0x1bd   : > { %347 = vst.msk [vmem:[%s229_s7] sm:$0xff] %vm323_vm2, %v346_v15 }
 0x1be   : > { %679 = shalt.err (!%p676_p11)
}
 0x1bf   : > { %s680_s9 = scalar_lea.hbm %s988_s28, 128  ;;  %s684_s19 = scalar_lea.hbm %s1041_s3, 256 }
 0x1c0   : > { %p681_p0 = scmp.ne.s32.totalorder %s988_s28, %s680_s9  ;;  %p685_p6 = scmp.lt.u32.totalorder %s988_s28, %s1041_s3 }
 0x1c1   : > { %p686_p7 = scmp.lt.u32.totalorder %s684_s19, %s680_s9  ;;  %p688_p8 = scmp.lt.u32.totalorder %s680_s9, %s988_s28 }
 0x1c2   : > { %p682_p4 = pnand %p681_p0, %p1056_p2 }
 0x1c3   : > { %p687_p12 = por %p686_p7, %p685_p6 }
 0x1c4   : > { %p683_p13 = pneg %p682_p4 }
 0x1c5   : > { %p689_p1 = por %p688_p8, %p687_p12 }
 0x1c7   : > { %p690_p10 = pnand %p689_p1, %p683_p13 }
 0x1c9   : > { %693 = shalt.err (!%p690_p10)
}
 0x1ca   : > { %500 = dma.vmem_to_hbm [thread:$0]  (%p1056_p2), %s990_s8, 128, %s988_s28, %s349_s25  }
 0x1cb PF: > { %s375_s24 = sand.u32 1, %s732_s12   ;;  %p1057_p3 = scmp.ne.s32.totalorder %s1049_s23, 0 }
 0x1cc   : > { %p1058_p5 = scmp.ge.s32.totalorder %s752_s17, 2  ;;  %s376_s6 = scalar_lea.sflag [#allocation5], %s375_s24 }
 0x1ce   : > { %p514_p9 = pnand %p1058_p5, %p1057_p3 }
 0x1d0   : > { %727 = dma.done.wait (!%p514_p9), %s376_s6, 128  }
 0x1d1   : > { %729 = vsyncadd (!%p514_p9), %s376_s6, 4294967168  ;;  %s20_s17 = sadd.s32 1, %s752_s17   ;;  %s1059_s12 = smov %s736_s13 }
 0x1d2   : > { %p17_p11 = scmp.ge.s32.totalorder %s20_s17, 4   ;;  %s1060_s13 = smov %s740_s14 }
 0x1d3   : > { %s1061_s14 = smov %s926_s30  ;;  %s1062_s15 = smov %s748_s16 }
 0x1d4   : > { %s1063_s16 = smov %s1065_s11  ;;  %19 = sbr.rel (!%p17_p11) target bundleno = 7 (0x7), region = 89 }
 0x1db   :  { %381 = vsyncpa [#allocation4], 1 }
 0x1dc   :  { %383 = vsyncpa [#allocation4 + $0x1], 1 }
 0x1dd   :  { %384 = vsyncpa [#allocation7], 1 }
 0x1de   :  { %385 = vsyncpa [#allocation5], 1 }
 0x1df   :  { %387 = vsyncpa [#allocation5 + $0x1], 1 }

</bundles_post_ra>
